<compile_context>
chip_gen: v6e
topology: v6e:2x2x1
jax: 0.10.0
libtpu: 0.0.40
codegen_flags: <defaults>
</compile_context>

<pallas_src>
import jax
import jax.numpy as jnp
import numpy as np
from jax.experimental import pallas as pl
from jax.experimental.pallas import tpu as pltpu

_LN_EPS = 1e-5


def _round_up(x, m):
    return (x + m - 1) // m * m


# ----------------------------- parameter packing -----------------------------

_WEIGHT_ORDER = ("p1", "p2",
                 "enc_wvo", "enc_w1", "enc_w2",
                 "dec_wvo", "dec_w1", "dec_w2",
                 "wx1", "wx2")

_VECTOR_ORDER = ("p1_b", "n1_g", "n1_b",
                 "p2_b", "n2_g", "n2_b",
                 "enc_bvo", "enc_ln1_g", "enc_ln1_b", "enc_b1", "enc_b2",
                 "enc_ln2_g", "enc_ln2_b",
                 "dec_bvo", "dec_ln1_g", "dec_ln1_b", "dec_b1", "dec_b2",
                 "dec_ln2_g", "dec_ln2_b",
                 "wx1_b", "nwx_g", "nwx_b", "wx2_b")


def _fold_and_collect(params):
    """Fold V/O attention projections and collect matrices/vectors by name."""
    w = {
        "p1": params["p1_w"], "p2": params["p2_w"],
        "enc_w1": params["enc_w1"], "enc_w2": params["enc_w2"],
        "dec_w1": params["dec_w1"], "dec_w2": params["dec_w2"],
        "wx1": params["wx1_w"], "wx2": params["wx2_w"],
    }
    v = {
        "p1_b": params["p1_b"], "n1_g": params["n1_g"], "n1_b": params["n1_b"],
        "p2_b": params["p2_b"], "n2_g": params["n2_g"], "n2_b": params["n2_b"],
        "wx1_b": params["wx1_b"], "nwx_g": params["nwx_g"], "nwx_b": params["nwx_b"],
        "wx2_b": params["wx2_b"],
    }
    for pre in ("enc", "dec"):
        # seq_len == 1 -> softmax over the single key is identically 1.0, so the
        # attention context equals the value projection exactly; fold V and O
        # into one matmul.  Q/K projections cannot influence the output.
        w[f"{pre}_wvo"] = params[f"{pre}_wv"] @ params[f"{pre}_wo"]
        v[f"{pre}_bvo"] = params[f"{pre}_bv"] @ params[f"{pre}_wo"] + params[f"{pre}_bo"]
        for n in ("ln1_g", "ln1_b", "b1", "b2", "ln2_g", "ln2_b"):
            v[f"{pre}_{n}"] = params[f"{pre}_{n}"]
    return w, v


def _pack_params(params):
    """Pack all weight matrices into one lane-aligned slab and all 1-D params
    into a second slab.  Returns (wslab, vslab, layout) with static offsets."""
    w, v = _fold_and_collect(params)

    lane_w = _round_up(max(int(w[n].shape[1]) for n in _WEIGHT_ORDER), 128)
    w_layout, w_blocks, row = {}, [], 0
    for n in _WEIGHT_ORDER:
        a = w[n].astype(jnp.float32)
        r, c = a.shape
        rp = _round_up(r, 8)                       # keep sublane offsets 8-aligned
        w_layout[n] = (row, r, c)
        w_blocks.append(jnp.pad(a, ((0, rp - r), (0, lane_w - c))))
        row += rp
    wslab = jnp.concatenate(w_blocks, axis=0)

    lane_v = _round_up(max(int(v[n].shape[0]) for n in _VECTOR_ORDER), 128)
    v_layout, v_rows = {}, []
    for i, n in enumerate(_VECTOR_ORDER):
        a = v[n].astype(jnp.float32)
        d = int(a.shape[0])
        v_layout[n] = (i, d)
        v_rows.append(jnp.pad(a, (0, lane_v - d))[None, :])
    n_vrows = _round_up(len(_VECTOR_ORDER), 8)
    if n_vrows > len(_VECTOR_ORDER):
        v_rows.append(jnp.zeros((n_vrows - len(_VECTOR_ORDER), lane_v), jnp.float32))
    vslab = jnp.concatenate(v_rows, axis=0)

    return wslab, vslab, {"w": w_layout, "v": v_layout}


# ----------------------------- fused kernel -----------------------------

def _make_kernel(layout, feature_len, dff, out_lanes):
    w_layout = layout["w"]
    v_layout = layout["v"]

    def wmat(wref, name):                          # static slice -> zero cost view
        r0, r, c = w_layout[name]
        return wref[r0:r0 + r, 0:c]

    def vrow(vref, name):                          # (1, d), broadcasts over rows
        i, d = v_layout[name]
        return vref[i:i + 1, 0:d]

    def linear(x, wref, vref, wname, bname):
        return (jnp.dot(x, wmat(wref, wname), preferred_element_type=jnp.float32)
                + vrow(vref, bname))

    def layer_norm(y, vref, gname, bname):
        # single-pass statistics: var = E[y^2] - E[y]^2
        inv_n = 1.0 / y.shape[-1]
        mu = jnp.sum(y, axis=-1, keepdims=True) * inv_n
        ex2 = jnp.sum(y * y, axis=-1, keepdims=True) * inv_n
        var = ex2 - mu * mu
        return ((y - mu) * jax.lax.rsqrt(var + _LN_EPS)
                * vrow(vref, gname) + vrow(vref, bname))

    def block(x, wref, vref, pre):
        # post-norm self-attention (folded V*O, seq_len == 1) + FFN
        attn = linear(x, wref, vref, f"{pre}_wvo", f"{pre}_bvo")
        y = layer_norm(x + attn, vref, f"{pre}_ln1_g", f"{pre}_ln1_b")
        ff = jnp.maximum(linear(y, wref, vref, f"{pre}_w1", f"{pre}_b1"), 0.0)
        ff = linear(ff, wref, vref, f"{pre}_w2", f"{pre}_b2")
        return layer_norm(y + ff, vref, f"{pre}_ln2_g", f"{pre}_ln2_b")

    def kernel(x_ref, wref, vref, out_ref):
        x = x_ref[...]                              # (rows, feature_len) f32

        # input_proj_x1 -> norm_x1 -> ReLU -> dropout (identity)
        h = linear(x, wref, vref, "p1", "p1_b")
        h = jnp.maximum(layer_norm(h, vref, "n1_g", "n1_b"), 0.0)
        # input_proj_x2 -> norm_x2 -> ReLU -> dropout (identity)
        h = linear(h, wref, vref, "p2", "p2_b")
        h = jnp.maximum(layer_norm(h, vref, "n2_g", "n2_b"), 0.0)

        hs = block(h, wref, vref, "enc")            # transformerEncoder
        rec = block(hs, wref, vref, "dec")          # transformerDecoder

        # W_x1 -> norm_wx -> ReLU -> dropout (identity), then W_x2
        ph = linear(rec, wref, vref, "wx1", "wx1_b")
        ph = jnp.maximum(layer_norm(ph, vref, "nwx_g", "nwx_b"), 0.0)
        rec_x = linear(ph, wref, vref, "wx2", "wx2_b")

        # lane-dense packed output: [rec_x | hs | zero pad] -> one full-lane store
        parts = [rec_x, hs]
        pad = out_lanes - feature_len - dff
        if pad:
            parts.append(jnp.zeros((x.shape[0], pad), jnp.float32))
        out_ref[...] = jnp.concatenate(parts, axis=-1)

    return kernel


# ----------------------------- pallas_call wrapper -----------------------------

def _choose_row_tiling(n_rows, max_tile=1024):
    """Return (row_tile, padded_rows): rows padded to a multiple of 8, tile
    chosen so the grid has >= 2 steps whenever possible (v7x dual-TC)."""
    rows8 = _round_up(n_rows, 8)
    if rows8 <= 8:
        return rows8, rows8
    tile = min(max_tile, _round_up((rows8 + 1) // 2, 8))
    padded = _round_up(rows8, tile)
    return tile, padded


def pre_train_model_forward(params, src):
    """src: (1, N, feature_len) -> (rec_x (1, N, feature_len), hs (1, N, dff))."""
    assert src.shape[0] == 1, "kernel assumes sequence length 1 (forward() unsqueezes)"
    in_x = src[0].astype(jnp.float32)               # src[0] -> (N, feature_len)
    n_rows, feature_len = in_x.shape
    dff = int(params["p2_w"].shape[1])

    wslab, vslab, layout = _pack_params(params)

    row_tile, padded_rows = _choose_row_tiling(n_rows)
    if padded_rows != n_rows:
        in_x = jnp.pad(in_x, ((0, padded_rows - n_rows), (0, 0)))
    grid = (padded_rows // row_tile,)

    out_lanes = _round_up(feature_len + dff, 128)
    kernel = _make_kernel(layout, feature_len, dff, out_lanes)

    packed = pl.pallas_call(
        kernel,
        out_shape=jax.ShapeDtypeStruct((padded_rows, out_lanes), jnp.float32),
        grid=grid,
        in_specs=[
            pl.BlockSpec((row_tile, feature_len), lambda i: (i, 0)),
            pl.BlockSpec(wslab.shape, lambda i: (0, 0)),   # grid-invariant weight slab
            pl.BlockSpec(vslab.shape, lambda i: (0, 0)),   # grid-invariant bias/LN slab
        ],
        out_specs=pl.BlockSpec((row_tile, out_lanes), lambda i: (i, 0)),
        compiler_params=pltpu.CompilerParams(
            dimension_semantics=("parallel",),             # rows are independent (seq==1)
            vmem_limit_bytes=32 * 1024 * 1024,
        ),
    )(in_x, wslab, vslab)

    rec_x = packed[:n_rows, :feature_len]
    hs = packed[:n_rows, feature_len:feature_len + dff]
    return rec_x[None], hs[None]                     # unsqueeze(0) on both outputs


# ----------------------------- parameters -----------------------------

def _dense_init(key, fan_in, fan_out):
    kw, kb = jax.random.split(key)
    w = jax.random.normal(kw, (fan_in, fan_out), jnp.float32) * 0.05
    b = jax.random.normal(kb, (fan_out,), jnp.float32) * 0.05
    return w, b


def _ln_init(dim):
    return jnp.ones((dim,), jnp.float32), jnp.zeros((dim,), jnp.float32)


def _layer_init(key, prefix, d_model, ffn_hidden, params):
    keys = jax.random.split(key, 6)
    # Q/K projections exist in the modeled attention but, with seq_len == 1,
    # cannot affect the forward output; kept for parameter-set fidelity.
    params[f"{prefix}_wq"], params[f"{prefix}_bq"] = _dense_init(keys[0], d_model, d_model)
    params[f"{prefix}_wk"], params[f"{prefix}_bk"] = _dense_init(keys[1], d_model, d_model)
    params[f"{prefix}_wv"], params[f"{prefix}_bv"] = _dense_init(keys[2], d_model, d_model)
    params[f"{prefix}_wo"], params[f"{prefix}_bo"] = _dense_init(keys[3], d_model, d_model)
    params[f"{prefix}_ln1_g"], params[f"{prefix}_ln1_b"] = _ln_init(d_model)
    params[f"{prefix}_w1"], params[f"{prefix}_b1"] = _dense_init(keys[4], d_model, ffn_hidden)
    params[f"{prefix}_w2"], params[f"{prefix}_b2"] = _dense_init(keys[5], ffn_hidden, d_model)
    params[f"{prefix}_ln2_g"], params[f"{prefix}_ln2_b"] = _ln_init(d_model)


def init_params(key, feature_len, dff, ffn_hidden):
    keys = jax.random.split(key, 6)
    params = {}
    params["p1_w"], params["p1_b"] = _dense_init(keys[0], feature_len, dff * 2)
    params["n1_g"], params["n1_b"] = _ln_init(dff * 2)
    params["p2_w"], params["p2_b"] = _dense_init(keys[1], dff * 2, dff)
    params["n2_g"], params["n2_b"] = _ln_init(dff)
    _layer_init(keys[2], "enc", dff, ffn_hidden, params)
    _layer_init(keys[3], "dec", dff, ffn_hidden, params)
    params["wx1_w"], params["wx1_b"] = _dense_init(keys[4], dff, dff * 2)
    params["nwx_g"], params["nwx_b"] = _ln_init(dff * 2)
    params["wx2_w"], params["wx2_b"] = _dense_init(keys[5], dff * 2, feature_len)
    return params


# ----------------------------- pure-JAX reference (unfused) -----------------------------

def _reference_forward(params, src):
    def ln(y, g, b):
        mu = jnp.mean(y, axis=-1, keepdims=True)
        var = jnp.mean((y - mu) ** 2, axis=-1, keepdims=True)
        return (y - mu) / jnp.sqrt(var + _LN_EPS) * g + b

    def layer(x, pre):
        v = x @ params[f"{pre}_wv"] + params[f"{pre}_bv"]
        attn = v @ params[f"{pre}_wo"] + params[f"{pre}_bo"]   # softmax == 1 (seq 1)
        y = ln(x + attn, params[f"{pre}_ln1_g"], params[f"{pre}_ln1_b"])
        ff = jnp.maximum(y @ params[f"{pre}_w1"] + params[f"{pre}_b1"], 0.0)
        ff = ff @ params[f"{pre}_w2"] + params[f"{pre}_b2"]
        return ln(y + ff, params[f"{pre}_ln2_g"], params[f"{pre}_ln2_b"])

    x = src[0]
    h = jnp.maximum(ln(x @ params["p1_w"] + params["p1_b"],
                       params["n1_g"], params["n1_b"]), 0.0)
    h = jnp.maximum(ln(h @ params["p2_w"] + params["p2_b"],
                       params["n2_g"], params["n2_b"]), 0.0)
    hs = layer(h, "enc")
    rec = layer(hs, "dec")
    ph = jnp.maximum(ln(rec @ params["wx1_w"] + params["wx1_b"],
                        params["nwx_g"], params["nwx_b"]), 0.0)
    rec_x = ph @ params["wx2_w"] + params["wx2_b"]
    return rec_x[None], hs[None]


# ----------------------------- demo -----------------------------

if __name__ == "__main__":
    FEATURE_LEN = 64   # feature_len[0]
    DFF = 32           # transformerEncoder.dim_feedforward
    FFN_HIDDEN = 64    # modeled transformer-layer FFN width
    BATCH = 8

    key = jax.random.PRNGKey(0)
    k_param, k_x = jax.random.split(key)
    params = init_params(k_param, FEATURE_LEN, DFF, FFN_HIDDEN)
    src = jax.random.normal(k_x, (1, BATCH, FEATURE_LEN), jnp.float32)

    fwd = jax.jit(pre_train_model_forward)
    rec_x, hs = fwd(params, src)
    jax.block_until_ready((rec_x, hs))

    assert rec_x.shape == (1, BATCH, FEATURE_LEN)
    assert hs.shape == (1, BATCH, DFF)

    ref_rec, ref_hs = jax.jit(_reference_forward)(params, src)
    np.testing.assert_allclose(np.asarray(rec_x), np.asarray(ref_rec), rtol=1e-3, atol=1e-3)
    np.testing.assert_allclose(np.asarray(hs), np.asarray(ref_hs), rtol=1e-3, atol=1e-3)

    print("KERNEL_OK")
</pallas_src>

<mosaic_0001>
module attributes {stable_mosaic.version = 11 : i64} {
  func.func @kernel(%arg0: i32, %arg1: memref<8x64xf32, #tpu.memory_space<vmem>>, %arg2: memref<480x128xf32, #tpu.memory_space<vmem>>, %arg3: memref<24x128xf32, #tpu.memory_space<vmem>>, %arg4: memref<8x128xf32, #tpu.memory_space<vmem>>) attributes {dimension_semantics = [#tpu.dimension_semantics<parallel>], iteration_bounds = array<i64: 1>, scalar_prefetch = 0 : i64, scratch_operands = 0 : i64, tpu.core_type = #tpu.core_type<tc>, window_params = [{transform_indices = @transform_0, window_bounds = array<i64: 8, 64>}, {pipeline_mode = #tpu.pipeline_mode<synchronous>, transform_indices = @transform_1, window_bounds = array<i64: 480, 128>}, {pipeline_mode = #tpu.pipeline_mode<synchronous>, transform_indices = @transform_2, window_bounds = array<i64: 24, 128>}, {transform_indices = @transform_3, window_bounds = array<i64: 8, 128>}]} {
    %c0 = arith.constant 0 : index
    %c0_0 = arith.constant 0 : index
    %0 = vector.load %arg1[%c0, %c0_0] : memref<8x64xf32, #tpu.memory_space<vmem>>, vector<8x64xf32>
    %c0_1 = arith.constant 0 : index
    %c0_2 = arith.constant 0 : index
    %1 = vector.load %arg2[%c0_1, %c0_2] : memref<480x128xf32, #tpu.memory_space<vmem>>, vector<64x64xf32>
    %cst = arith.constant dense<0.000000e+00> : vector<8x64xf32>
    %2 = tpu.matmul %0, %1, %cst {dimension_numbers = #tpu.dot_dimension_numbers<[1], [0], [0], [1], [0, 0, 1, 1], [], []>} : vector<8x64xf32>, vector<64x64xf32>, vector<8x64xf32> -> vector<8x64xf32>
    %c0_3 = arith.constant 0 : index
    %c0_4 = arith.constant 0 : index
    %3 = vector.load %arg3[%c0_3, %c0_4] : memref<24x128xf32, #tpu.memory_space<vmem>>, vector<1x64xf32>
    %4 = vector.broadcast %3 : vector<1x64xf32> to vector<8x64xf32>
    %5 = arith.addf %2, %4 : vector<8x64xf32>
    %cst_5 = arith.constant dense<0.000000e+00> : vector<8xf32>
    %6 = vector.multi_reduction <add>, %5, %cst_5 [1] : vector<8x64xf32> to vector<8xf32>
    %7 = vector.shape_cast %6 : vector<8xf32> to vector<8x1xf32>
    %cst_6 = arith.constant 1.562500e-02 : f32
    %8 = vector.broadcast %cst_6 : f32 to vector<8x1xf32>
    %9 = arith.mulf %7, %8 : vector<8x1xf32>
    %10 = arith.mulf %5, %5 : vector<8x64xf32>
    %cst_7 = arith.constant dense<0.000000e+00> : vector<8xf32>
    %11 = vector.multi_reduction <add>, %10, %cst_7 [1] : vector<8x64xf32> to vector<8xf32>
    %12 = vector.shape_cast %11 : vector<8xf32> to vector<8x1xf32>
    %cst_8 = arith.constant 1.562500e-02 : f32
    %13 = vector.broadcast %cst_8 : f32 to vector<8x1xf32>
    %14 = arith.mulf %12, %13 : vector<8x1xf32>
    %15 = arith.mulf %9, %9 : vector<8x1xf32>
    %16 = arith.subf %14, %15 : vector<8x1xf32>
    %17 = vector.broadcast %9 : vector<8x1xf32> to vector<8x64xf32>
    %18 = arith.subf %5, %17 : vector<8x64xf32>
    %cst_9 = arith.constant 9.99999974E-6 : f32
    %19 = vector.broadcast %cst_9 : f32 to vector<8x1xf32>
    %20 = arith.addf %16, %19 : vector<8x1xf32>
    %21 = math.rsqrt %20 : vector<8x1xf32>
    %22 = vector.broadcast %21 : vector<8x1xf32> to vector<8x64xf32>
    %23 = arith.mulf %18, %22 : vector<8x64xf32>
    %c1 = arith.constant 1 : index
    %c0_10 = arith.constant 0 : index
    %24 = vector.load %arg3[%c1, %c0_10] : memref<24x128xf32, #tpu.memory_space<vmem>>, vector<1x64xf32>
    %25 = vector.broadcast %24 : vector<1x64xf32> to vector<8x64xf32>
    %26 = arith.mulf %23, %25 : vector<8x64xf32>
    %c2 = arith.constant 2 : index
    %c0_11 = arith.constant 0 : index
    %27 = vector.load %arg3[%c2, %c0_11] : memref<24x128xf32, #tpu.memory_space<vmem>>, vector<1x64xf32>
    %28 = vector.broadcast %27 : vector<1x64xf32> to vector<8x64xf32>
    %29 = arith.addf %26, %28 : vector<8x64xf32>
    %cst_12 = arith.constant 0.000000e+00 : f32
    %30 = vector.broadcast %cst_12 : f32 to vector<8x64xf32>
    %31 = arith.maximumf %29, %30 : vector<8x64xf32>
    %c64 = arith.constant 64 : index
    %c0_13 = arith.constant 0 : index
    %32 = vector.load %arg2[%c64, %c0_13] : memref<480x128xf32, #tpu.memory_space<vmem>>, vector<64x32xf32>
    %cst_14 = arith.constant dense<0.000000e+00> : vector<8x32xf32>
    %33 = tpu.matmul %31, %32, %cst_14 {dimension_numbers = #tpu.dot_dimension_numbers<[1], [0], [0], [1], [0, 0, 1, 1], [], []>} : vector<8x64xf32>, vector<64x32xf32>, vector<8x32xf32> -> vector<8x32xf32>
    %c3 = arith.constant 3 : index
    %c0_15 = arith.constant 0 : index
    %34 = vector.load %arg3[%c3, %c0_15] : memref<24x128xf32, #tpu.memory_space<vmem>>, vector<1x32xf32>
    %35 = vector.broadcast %34 : vector<1x32xf32> to vector<8x32xf32>
    %36 = arith.addf %33, %35 : vector<8x32xf32>
    %cst_16 = arith.constant dense<0.000000e+00> : vector<8xf32>
    %37 = vector.multi_reduction <add>, %36, %cst_16 [1] : vector<8x32xf32> to vector<8xf32>
    %38 = vector.shape_cast %37 : vector<8xf32> to vector<8x1xf32>
    %cst_17 = arith.constant 3.125000e-02 : f32
    %39 = vector.broadcast %cst_17 : f32 to vector<8x1xf32>
    %40 = arith.mulf %38, %39 : vector<8x1xf32>
    %41 = arith.mulf %36, %36 : vector<8x32xf32>
    %cst_18 = arith.constant dense<0.000000e+00> : vector<8xf32>
    %42 = vector.multi_reduction <add>, %41, %cst_18 [1] : vector<8x32xf32> to vector<8xf32>
    %43 = vector.shape_cast %42 : vector<8xf32> to vector<8x1xf32>
    %cst_19 = arith.constant 3.125000e-02 : f32
    %44 = vector.broadcast %cst_19 : f32 to vector<8x1xf32>
    %45 = arith.mulf %43, %44 : vector<8x1xf32>
    %46 = arith.mulf %40, %40 : vector<8x1xf32>
    %47 = arith.subf %45, %46 : vector<8x1xf32>
    %48 = vector.broadcast %40 : vector<8x1xf32> to vector<8x32xf32>
    %49 = arith.subf %36, %48 : vector<8x32xf32>
    %cst_20 = arith.constant 9.99999974E-6 : f32
    %50 = vector.broadcast %cst_20 : f32 to vector<8x1xf32>
    %51 = arith.addf %47, %50 : vector<8x1xf32>
    %52 = math.rsqrt %51 : vector<8x1xf32>
    %53 = vector.broadcast %52 : vector<8x1xf32> to vector<8x32xf32>
    %54 = arith.mulf %49, %53 : vector<8x32xf32>
    %c4 = arith.constant 4 : index
    %c0_21 = arith.constant 0 : index
    %55 = vector.load %arg3[%c4, %c0_21] : memref<24x128xf32, #tpu.memory_space<vmem>>, vector<1x32xf32>
    %56 = vector.broadcast %55 : vector<1x32xf32> to vector<8x32xf32>
    %57 = arith.mulf %54, %56 : vector<8x32xf32>
    %c5 = arith.constant 5 : index
    %c0_22 = arith.constant 0 : index
    %58 = vector.load %arg3[%c5, %c0_22] : memref<24x128xf32, #tpu.memory_space<vmem>>, vector<1x32xf32>
    %59 = vector.broadcast %58 : vector<1x32xf32> to vector<8x32xf32>
    %60 = arith.addf %57, %59 : vector<8x32xf32>
    %cst_23 = arith.constant 0.000000e+00 : f32
    %61 = vector.broadcast %cst_23 : f32 to vector<8x32xf32>
    %62 = arith.maximumf %60, %61 : vector<8x32xf32>
    %c128 = arith.constant 128 : index
    %c0_24 = arith.constant 0 : index
    %63 = vector.load %arg2[%c128, %c0_24] : memref<480x128xf32, #tpu.memory_space<vmem>>, vector<32x32xf32>
    %cst_25 = arith.constant dense<0.000000e+00> : vector<8x32xf32>
    %64 = tpu.matmul %62, %63, %cst_25 {dimension_numbers = #tpu.dot_dimension_numbers<[1], [0], [0], [1], [0, 0, 1, 1], [], []>} : vector<8x32xf32>, vector<32x32xf32>, vector<8x32xf32> -> vector<8x32xf32>
    %c6 = arith.constant 6 : index
    %c0_26 = arith.constant 0 : index
    %65 = vector.load %arg3[%c6, %c0_26] : memref<24x128xf32, #tpu.memory_space<vmem>>, vector<1x32xf32>
    %66 = vector.broadcast %65 : vector<1x32xf32> to vector<8x32xf32>
    %67 = arith.addf %64, %66 : vector<8x32xf32>
    %68 = arith.addf %62, %67 : vector<8x32xf32>
    %cst_27 = arith.constant dense<0.000000e+00> : vector<8xf32>
    %69 = vector.multi_reduction <add>, %68, %cst_27 [1] : vector<8x32xf32> to vector<8xf32>
    %70 = vector.shape_cast %69 : vector<8xf32> to vector<8x1xf32>
    %cst_28 = arith.constant 3.125000e-02 : f32
    %71 = vector.broadcast %cst_28 : f32 to vector<8x1xf32>
    %72 = arith.mulf %70, %71 : vector<8x1xf32>
    %73 = arith.mulf %68, %68 : vector<8x32xf32>
    %cst_29 = arith.constant dense<0.000000e+00> : vector<8xf32>
    %74 = vector.multi_reduction <add>, %73, %cst_29 [1] : vector<8x32xf32> to vector<8xf32>
    %75 = vector.shape_cast %74 : vector<8xf32> to vector<8x1xf32>
    %cst_30 = arith.constant 3.125000e-02 : f32
    %76 = vector.broadcast %cst_30 : f32 to vector<8x1xf32>
    %77 = arith.mulf %75, %76 : vector<8x1xf32>
    %78 = arith.mulf %72, %72 : vector<8x1xf32>
    %79 = arith.subf %77, %78 : vector<8x1xf32>
    %80 = vector.broadcast %72 : vector<8x1xf32> to vector<8x32xf32>
    %81 = arith.subf %68, %80 : vector<8x32xf32>
    %cst_31 = arith.constant 9.99999974E-6 : f32
    %82 = vector.broadcast %cst_31 : f32 to vector<8x1xf32>
    %83 = arith.addf %79, %82 : vector<8x1xf32>
    %84 = math.rsqrt %83 : vector<8x1xf32>
    %85 = vector.broadcast %84 : vector<8x1xf32> to vector<8x32xf32>
    %86 = arith.mulf %81, %85 : vector<8x32xf32>
    %c7 = arith.constant 7 : index
    %c0_32 = arith.constant 0 : index
    %87 = vector.load %arg3[%c7, %c0_32] : memref<24x128xf32, #tpu.memory_space<vmem>>, vector<1x32xf32>
    %88 = vector.broadcast %87 : vector<1x32xf32> to vector<8x32xf32>
    %89 = arith.mulf %86, %88 : vector<8x32xf32>
    %c8 = arith.constant 8 : index
    %c0_33 = arith.constant 0 : index
    %90 = vector.load %arg3[%c8, %c0_33] : memref<24x128xf32, #tpu.memory_space<vmem>>, vector<1x32xf32>
    %91 = vector.broadcast %90 : vector<1x32xf32> to vector<8x32xf32>
    %92 = arith.addf %89, %91 : vector<8x32xf32>
    %c160 = arith.constant 160 : index
    %c0_34 = arith.constant 0 : index
    %93 = vector.load %arg2[%c160, %c0_34] : memref<480x128xf32, #tpu.memory_space<vmem>>, vector<32x64xf32>
    %cst_35 = arith.constant dense<0.000000e+00> : vector<8x64xf32>
    %94 = tpu.matmul %92, %93, %cst_35 {dimension_numbers = #tpu.dot_dimension_numbers<[1], [0], [0], [1], [0, 0, 1, 1], [], []>} : vector<8x32xf32>, vector<32x64xf32>, vector<8x64xf32> -> vector<8x64xf32>
    %c9 = arith.constant 9 : index
    %c0_36 = arith.constant 0 : index
    %95 = vector.load %arg3[%c9, %c0_36] : memref<24x128xf32, #tpu.memory_space<vmem>>, vector<1x64xf32>
    %96 = vector.broadcast %95 : vector<1x64xf32> to vector<8x64xf32>
    %97 = arith.addf %94, %96 : vector<8x64xf32>
    %cst_37 = arith.constant 0.000000e+00 : f32
    %98 = vector.broadcast %cst_37 : f32 to vector<8x64xf32>
    %99 = arith.maximumf %97, %98 : vector<8x64xf32>
    %c192 = arith.constant 192 : index
    %c0_38 = arith.constant 0 : index
    %100 = vector.load %arg2[%c192, %c0_38] : memref<480x128xf32, #tpu.memory_space<vmem>>, vector<64x32xf32>
    %cst_39 = arith.constant dense<0.000000e+00> : vector<8x32xf32>
    %101 = tpu.matmul %99, %100, %cst_39 {dimension_numbers = #tpu.dot_dimension_numbers<[1], [0], [0], [1], [0, 0, 1, 1], [], []>} : vector<8x64xf32>, vector<64x32xf32>, vector<8x32xf32> -> vector<8x32xf32>
    %c10 = arith.constant 10 : index
    %c0_40 = arith.constant 0 : index
    %102 = vector.load %arg3[%c10, %c0_40] : memref<24x128xf32, #tpu.memory_space<vmem>>, vector<1x32xf32>
    %103 = vector.broadcast %102 : vector<1x32xf32> to vector<8x32xf32>
    %104 = arith.addf %101, %103 : vector<8x32xf32>
    %105 = arith.addf %92, %104 : vector<8x32xf32>
    %cst_41 = arith.constant dense<0.000000e+00> : vector<8xf32>
    %106 = vector.multi_reduction <add>, %105, %cst_41 [1] : vector<8x32xf32> to vector<8xf32>
    %107 = vector.shape_cast %106 : vector<8xf32> to vector<8x1xf32>
    %cst_42 = arith.constant 3.125000e-02 : f32
    %108 = vector.broadcast %cst_42 : f32 to vector<8x1xf32>
    %109 = arith.mulf %107, %108 : vector<8x1xf32>
    %110 = arith.mulf %105, %105 : vector<8x32xf32>
    %cst_43 = arith.constant dense<0.000000e+00> : vector<8xf32>
    %111 = vector.multi_reduction <add>, %110, %cst_43 [1] : vector<8x32xf32> to vector<8xf32>
    %112 = vector.shape_cast %111 : vector<8xf32> to vector<8x1xf32>
    %cst_44 = arith.constant 3.125000e-02 : f32
    %113 = vector.broadcast %cst_44 : f32 to vector<8x1xf32>
    %114 = arith.mulf %112, %113 : vector<8x1xf32>
    %115 = arith.mulf %109, %109 : vector<8x1xf32>
    %116 = arith.subf %114, %115 : vector<8x1xf32>
    %117 = vector.broadcast %109 : vector<8x1xf32> to vector<8x32xf32>
    %118 = arith.subf %105, %117 : vector<8x32xf32>
    %cst_45 = arith.constant 9.99999974E-6 : f32
    %119 = vector.broadcast %cst_45 : f32 to vector<8x1xf32>
    %120 = arith.addf %116, %119 : vector<8x1xf32>
    %121 = math.rsqrt %120 : vector<8x1xf32>
    %122 = vector.broadcast %121 : vector<8x1xf32> to vector<8x32xf32>
    %123 = arith.mulf %118, %122 : vector<8x32xf32>
    %c11 = arith.constant 11 : index
    %c0_46 = arith.constant 0 : index
    %124 = vector.load %arg3[%c11, %c0_46] : memref<24x128xf32, #tpu.memory_space<vmem>>, vector<1x32xf32>
    %125 = vector.broadcast %124 : vector<1x32xf32> to vector<8x32xf32>
    %126 = arith.mulf %123, %125 : vector<8x32xf32>
    %c12 = arith.constant 12 : index
    %c0_47 = arith.constant 0 : index
    %127 = vector.load %arg3[%c12, %c0_47] : memref<24x128xf32, #tpu.memory_space<vmem>>, vector<1x32xf32>
    %128 = vector.broadcast %127 : vector<1x32xf32> to vector<8x32xf32>
    %129 = arith.addf %126, %128 : vector<8x32xf32>
    %c256 = arith.constant 256 : index
    %c0_48 = arith.constant 0 : index
    %130 = vector.load %arg2[%c256, %c0_48] : memref<480x128xf32, #tpu.memory_space<vmem>>, vector<32x32xf32>
    %cst_49 = arith.constant dense<0.000000e+00> : vector<8x32xf32>
    %131 = tpu.matmul %129, %130, %cst_49 {dimension_numbers = #tpu.dot_dimension_numbers<[1], [0], [0], [1], [0, 0, 1, 1], [], []>} : vector<8x32xf32>, vector<32x32xf32>, vector<8x32xf32> -> vector<8x32xf32>
    %c13 = arith.constant 13 : index
    %c0_50 = arith.constant 0 : index
    %132 = vector.load %arg3[%c13, %c0_50] : memref<24x128xf32, #tpu.memory_space<vmem>>, vector<1x32xf32>
    %133 = vector.broadcast %132 : vector<1x32xf32> to vector<8x32xf32>
    %134 = arith.addf %131, %133 : vector<8x32xf32>
    %135 = arith.addf %129, %134 : vector<8x32xf32>
    %cst_51 = arith.constant dense<0.000000e+00> : vector<8xf32>
    %136 = vector.multi_reduction <add>, %135, %cst_51 [1] : vector<8x32xf32> to vector<8xf32>
    %137 = vector.shape_cast %136 : vector<8xf32> to vector<8x1xf32>
    %cst_52 = arith.constant 3.125000e-02 : f32
    %138 = vector.broadcast %cst_52 : f32 to vector<8x1xf32>
    %139 = arith.mulf %137, %138 : vector<8x1xf32>
    %140 = arith.mulf %135, %135 : vector<8x32xf32>
    %cst_53 = arith.constant dense<0.000000e+00> : vector<8xf32>
    %141 = vector.multi_reduction <add>, %140, %cst_53 [1] : vector<8x32xf32> to vector<8xf32>
    %142 = vector.shape_cast %141 : vector<8xf32> to vector<8x1xf32>
    %cst_54 = arith.constant 3.125000e-02 : f32
    %143 = vector.broadcast %cst_54 : f32 to vector<8x1xf32>
    %144 = arith.mulf %142, %143 : vector<8x1xf32>
    %145 = arith.mulf %139, %139 : vector<8x1xf32>
    %146 = arith.subf %144, %145 : vector<8x1xf32>
    %147 = vector.broadcast %139 : vector<8x1xf32> to vector<8x32xf32>
    %148 = arith.subf %135, %147 : vector<8x32xf32>
    %cst_55 = arith.constant 9.99999974E-6 : f32
    %149 = vector.broadcast %cst_55 : f32 to vector<8x1xf32>
    %150 = arith.addf %146, %149 : vector<8x1xf32>
    %151 = math.rsqrt %150 : vector<8x1xf32>
    %152 = vector.broadcast %151 : vector<8x1xf32> to vector<8x32xf32>
    %153 = arith.mulf %148, %152 : vector<8x32xf32>
    %c14 = arith.constant 14 : index
    %c0_56 = arith.constant 0 : index
    %154 = vector.load %arg3[%c14, %c0_56] : memref<24x128xf32, #tpu.memory_space<vmem>>, vector<1x32xf32>
    %155 = vector.broadcast %154 : vector<1x32xf32> to vector<8x32xf32>
    %156 = arith.mulf %153, %155 : vector<8x32xf32>
    %c15 = arith.constant 15 : index
    %c0_57 = arith.constant 0 : index
    %157 = vector.load %arg3[%c15, %c0_57] : memref<24x128xf32, #tpu.memory_space<vmem>>, vector<1x32xf32>
    %158 = vector.broadcast %157 : vector<1x32xf32> to vector<8x32xf32>
    %159 = arith.addf %156, %158 : vector<8x32xf32>
    %c288 = arith.constant 288 : index
    %c0_58 = arith.constant 0 : index
    %160 = vector.load %arg2[%c288, %c0_58] : memref<480x128xf32, #tpu.memory_space<vmem>>, vector<32x64xf32>
    %cst_59 = arith.constant dense<0.000000e+00> : vector<8x64xf32>
    %161 = tpu.matmul %159, %160, %cst_59 {dimension_numbers = #tpu.dot_dimension_numbers<[1], [0], [0], [1], [0, 0, 1, 1], [], []>} : vector<8x32xf32>, vector<32x64xf32>, vector<8x64xf32> -> vector<8x64xf32>
    %c16 = arith.constant 16 : index
    %c0_60 = arith.constant 0 : index
    %162 = vector.load %arg3[%c16, %c0_60] : memref<24x128xf32, #tpu.memory_space<vmem>>, vector<1x64xf32>
    %163 = vector.broadcast %162 : vector<1x64xf32> to vector<8x64xf32>
    %164 = arith.addf %161, %163 : vector<8x64xf32>
    %cst_61 = arith.constant 0.000000e+00 : f32
    %165 = vector.broadcast %cst_61 : f32 to vector<8x64xf32>
    %166 = arith.maximumf %164, %165 : vector<8x64xf32>
    %c320 = arith.constant 320 : index
    %c0_62 = arith.constant 0 : index
    %167 = vector.load %arg2[%c320, %c0_62] : memref<480x128xf32, #tpu.memory_space<vmem>>, vector<64x32xf32>
    %cst_63 = arith.constant dense<0.000000e+00> : vector<8x32xf32>
    %168 = tpu.matmul %166, %167, %cst_63 {dimension_numbers = #tpu.dot_dimension_numbers<[1], [0], [0], [1], [0, 0, 1, 1], [], []>} : vector<8x64xf32>, vector<64x32xf32>, vector<8x32xf32> -> vector<8x32xf32>
    %c17 = arith.constant 17 : index
    %c0_64 = arith.constant 0 : index
    %169 = vector.load %arg3[%c17, %c0_64] : memref<24x128xf32, #tpu.memory_space<vmem>>, vector<1x32xf32>
    %170 = vector.broadcast %169 : vector<1x32xf32> to vector<8x32xf32>
    %171 = arith.addf %168, %170 : vector<8x32xf32>
    %172 = arith.addf %159, %171 : vector<8x32xf32>
    %cst_65 = arith.constant dense<0.000000e+00> : vector<8xf32>
    %173 = vector.multi_reduction <add>, %172, %cst_65 [1] : vector<8x32xf32> to vector<8xf32>
    %174 = vector.shape_cast %173 : vector<8xf32> to vector<8x1xf32>
    %cst_66 = arith.constant 3.125000e-02 : f32
    %175 = vector.broadcast %cst_66 : f32 to vector<8x1xf32>
    %176 = arith.mulf %174, %175 : vector<8x1xf32>
    %177 = arith.mulf %172, %172 : vector<8x32xf32>
    %cst_67 = arith.constant dense<0.000000e+00> : vector<8xf32>
    %178 = vector.multi_reduction <add>, %177, %cst_67 [1] : vector<8x32xf32> to vector<8xf32>
    %179 = vector.shape_cast %178 : vector<8xf32> to vector<8x1xf32>
    %cst_68 = arith.constant 3.125000e-02 : f32
    %180 = vector.broadcast %cst_68 : f32 to vector<8x1xf32>
    %181 = arith.mulf %179, %180 : vector<8x1xf32>
    %182 = arith.mulf %176, %176 : vector<8x1xf32>
    %183 = arith.subf %181, %182 : vector<8x1xf32>
    %184 = vector.broadcast %176 : vector<8x1xf32> to vector<8x32xf32>
    %185 = arith.subf %172, %184 : vector<8x32xf32>
    %cst_69 = arith.constant 9.99999974E-6 : f32
    %186 = vector.broadcast %cst_69 : f32 to vector<8x1xf32>
    %187 = arith.addf %183, %186 : vector<8x1xf32>
    %188 = math.rsqrt %187 : vector<8x1xf32>
    %189 = vector.broadcast %188 : vector<8x1xf32> to vector<8x32xf32>
    %190 = arith.mulf %185, %189 : vector<8x32xf32>
    %c18 = arith.constant 18 : index
    %c0_70 = arith.constant 0 : index
    %191 = vector.load %arg3[%c18, %c0_70] : memref<24x128xf32, #tpu.memory_space<vmem>>, vector<1x32xf32>
    %192 = vector.broadcast %191 : vector<1x32xf32> to vector<8x32xf32>
    %193 = arith.mulf %190, %192 : vector<8x32xf32>
    %c19 = arith.constant 19 : index
    %c0_71 = arith.constant 0 : index
    %194 = vector.load %arg3[%c19, %c0_71] : memref<24x128xf32, #tpu.memory_space<vmem>>, vector<1x32xf32>
    %195 = vector.broadcast %194 : vector<1x32xf32> to vector<8x32xf32>
    %196 = arith.addf %193, %195 : vector<8x32xf32>
    %c384 = arith.constant 384 : index
    %c0_72 = arith.constant 0 : index
    %197 = vector.load %arg2[%c384, %c0_72] : memref<480x128xf32, #tpu.memory_space<vmem>>, vector<32x64xf32>
    %cst_73 = arith.constant dense<0.000000e+00> : vector<8x64xf32>
    %198 = tpu.matmul %196, %197, %cst_73 {dimension_numbers = #tpu.dot_dimension_numbers<[1], [0], [0], [1], [0, 0, 1, 1], [], []>} : vector<8x32xf32>, vector<32x64xf32>, vector<8x64xf32> -> vector<8x64xf32>
    %c20 = arith.constant 20 : index
    %c0_74 = arith.constant 0 : index
    %199 = vector.load %arg3[%c20, %c0_74] : memref<24x128xf32, #tpu.memory_space<vmem>>, vector<1x64xf32>
    %200 = vector.broadcast %199 : vector<1x64xf32> to vector<8x64xf32>
    %201 = arith.addf %198, %200 : vector<8x64xf32>
    %cst_75 = arith.constant dense<0.000000e+00> : vector<8xf32>
    %202 = vector.multi_reduction <add>, %201, %cst_75 [1] : vector<8x64xf32> to vector<8xf32>
    %203 = vector.shape_cast %202 : vector<8xf32> to vector<8x1xf32>
    %cst_76 = arith.constant 1.562500e-02 : f32
    %204 = vector.broadcast %cst_76 : f32 to vector<8x1xf32>
    %205 = arith.mulf %203, %204 : vector<8x1xf32>
    %206 = arith.mulf %201, %201 : vector<8x64xf32>
    %cst_77 = arith.constant dense<0.000000e+00> : vector<8xf32>
    %207 = vector.multi_reduction <add>, %206, %cst_77 [1] : vector<8x64xf32> to vector<8xf32>
    %208 = vector.shape_cast %207 : vector<8xf32> to vector<8x1xf32>
    %cst_78 = arith.constant 1.562500e-02 : f32
    %209 = vector.broadcast %cst_78 : f32 to vector<8x1xf32>
    %210 = arith.mulf %208, %209 : vector<8x1xf32>
    %211 = arith.mulf %205, %205 : vector<8x1xf32>
    %212 = arith.subf %210, %211 : vector<8x1xf32>
    %213 = vector.broadcast %205 : vector<8x1xf32> to vector<8x64xf32>
    %214 = arith.subf %201, %213 : vector<8x64xf32>
    %cst_79 = arith.constant 9.99999974E-6 : f32
    %215 = vector.broadcast %cst_79 : f32 to vector<8x1xf32>
    %216 = arith.addf %212, %215 : vector<8x1xf32>
    %217 = math.rsqrt %216 : vector<8x1xf32>
    %218 = vector.broadcast %217 : vector<8x1xf32> to vector<8x64xf32>
    %219 = arith.mulf %214, %218 : vector<8x64xf32>
    %c21 = arith.constant 21 : index
    %c0_80 = arith.constant 0 : index
    %220 = vector.load %arg3[%c21, %c0_80] : memref<24x128xf32, #tpu.memory_space<vmem>>, vector<1x64xf32>
    %221 = vector.broadcast %220 : vector<1x64xf32> to vector<8x64xf32>
    %222 = arith.mulf %219, %221 : vector<8x64xf32>
    %c22 = arith.constant 22 : index
    %c0_81 = arith.constant 0 : index
    %223 = vector.load %arg3[%c22, %c0_81] : memref<24x128xf32, #tpu.memory_space<vmem>>, vector<1x64xf32>
    %224 = vector.broadcast %223 : vector<1x64xf32> to vector<8x64xf32>
    %225 = arith.addf %222, %224 : vector<8x64xf32>
    %cst_82 = arith.constant 0.000000e+00 : f32
    %226 = vector.broadcast %cst_82 : f32 to vector<8x64xf32>
    %227 = arith.maximumf %225, %226 : vector<8x64xf32>
    %c416 = arith.constant 416 : index
    %c0_83 = arith.constant 0 : index
    %228 = vector.load %arg2[%c416, %c0_83] : memref<480x128xf32, #tpu.memory_space<vmem>>, vector<64x64xf32>
    %cst_84 = arith.constant dense<0.000000e+00> : vector<8x64xf32>
    %229 = tpu.matmul %227, %228, %cst_84 {dimension_numbers = #tpu.dot_dimension_numbers<[1], [0], [0], [1], [0, 0, 1, 1], [], []>} : vector<8x64xf32>, vector<64x64xf32>, vector<8x64xf32> -> vector<8x64xf32>
    %c23 = arith.constant 23 : index
    %c0_85 = arith.constant 0 : index
    %230 = vector.load %arg3[%c23, %c0_85] : memref<24x128xf32, #tpu.memory_space<vmem>>, vector<1x64xf32>
    %231 = vector.broadcast %230 : vector<1x64xf32> to vector<8x64xf32>
    %232 = arith.addf %229, %231 : vector<8x64xf32>
    %cst_86 = arith.constant 0.000000e+00 : f32
    %233 = vector.broadcast %cst_86 : f32 to vector<8x32xf32>
    %234 = tpu.concatenate %232, %129, %233 in 1 : vector<8x64xf32>, vector<8x32xf32>, vector<8x32xf32> -> vector<8x128xf32>
    %c0_87 = arith.constant 0 : index
    %c0_88 = arith.constant 0 : index
    %235 = vector.load %arg4[%c0_87, %c0_88] : memref<8x128xf32, #tpu.memory_space<vmem>>, vector<8x128xf32>
    tpu.vector_store %arg4[%c0_87, %c0_88], %234 {strides = array<i32>} : memref<8x128xf32, #tpu.memory_space<vmem>>, vector<8x128xf32>,
    return
  }
  func.func @transform_0(%arg0: i32) -> (i32, i32) {
    %c0_i32 = arith.constant 0 : i32
    %c0_i32_0 = arith.constant 0 : i32
    return %arg0, %c0_i32 : i32, i32
  }
  func.func @transform_1(%arg0: i32) -> (i32, i32) {
    %c0_i32 = arith.constant 0 : i32
    %c0_i32_0 = arith.constant 0 : i32
    %c0_i32_1 = arith.constant 0 : i32
    return %c0_i32, %c0_i32_0 : i32, i32
  }
  func.func @transform_2(%arg0: i32) -> (i32, i32) {
    %c0_i32 = arith.constant 0 : i32
    %c0_i32_0 = arith.constant 0 : i32
    %c0_i32_1 = arith.constant 0 : i32
    return %c0_i32, %c0_i32_0 : i32, i32
  }
  func.func @transform_3(%arg0: i32) -> (i32, i32) {
    %c0_i32 = arith.constant 0 : i32
    %c0_i32_0 = arith.constant 0 : i32
    return %arg0, %c0_i32 : i32, i32
  }
}

</mosaic_0001>

<bundles_post_ra>
// kernel: pre_train_model_forward.1
= control target key start
LH: loop header
LB: loop body
LE: loop exit
PB: predicated region body
PF: predicated region fallthrough
CT: control target
= control target key end

     0   :  { %v1337_v0 = vmov 0.0   ;;  %vm1338_vm0 = vmmov 0   ;;  %vm28_vm1 = vcmask 523264   ;;  %vm216_vm2 = vcmask 261120   ;;  %s1339_s26 = smov 64   ;;  %s1728_s1 = inlined_call_operand.vmem [shape: f32[480,128], index: 1, kind: input, shape index: {}]   ;;  %s1729_s0 = inlined_call_operand.vmem [shape: f32[8,64], index: 0, kind: input, shape index: {}]   ;;  %s1730_s2 = inlined_call_operand.vmem [shape: f32[24,128], index: 2, kind: input, shape index: {}]   ;;  %s1731_s3 = inlined_call_operand.vmem [shape: f32[8,128], index: 3, kind: output, shape index: {}]  }
   0x1   :  { %1170 = vmatprep.subr.mxu0 %v1337_v0  ;;  %v22_v1 = vld [vmem:[%s1728_s1 + $0x38] sm:$0xff]  ;;  %v21_v2 = vld [vmem:[%s1728_s1 + $0x30] sm:$0xff]  ;;  %1186 = vmatprep.mubr.msk.f32.mxu0 %vm1338_vm0, %v1337_v0  ;;  %v20_v3 = vld [vmem:[%s1728_s1 + $0x28] sm:$0xff]  ;;  %vm1059_vm3 = vcmask 785408  }
   0x2   :  { %1171 = vmatpush3.msra.mxu0 %v22_v1  ;;  %1189 = vmatprep.subr.mxu1 %v1337_v0  ;;  %v19_v4 = vld [vmem:[%s1728_s1 + $0x20] sm:$0xff]  ;;  %v18_v5 = vld [vmem:[%s1728_s1 + $0x18] sm:$0xff]  ;;  %v17_v6 = vld [vmem:[%s1728_s1 + $0x10] sm:$0xff] }
   0x3   :  { %1172 = vmatprep.subr.mxu0 %v1337_v0  ;;  %1205 = vmatprep.mubr.msk.f32.mxu1 %vm1338_vm0, %v1337_v0  ;;  %v16_v7 = vld [vmem:[%s1728_s1 + $0x8] sm:$0xff]  ;;  %v15_v8 = vld [vmem:[%s1728_s1] sm:$0xff]  ;;  %v137_v17 = vld [vmem:[%s1728_s1 + $0x78] sm:$0xff] }
   0x4   :  { %1173 = vmatpush3.msra.mxu0 %v21_v2  ;;  %v14_v9 = vld [vmem:[%s1729_s0] sm:$0xff]  ;;  %v136_v18 = vld [vmem:[%s1728_s1 + $0x70] sm:$0xff]  ;;  %1190 = vmatpush3.msra.mxu1 %v137_v17  ;;  %v135_v19 = vld [vmem:[%s1728_s1 + $0x68] sm:$0xff] }
   0x5   :  { %1174 = vmatprep.subr.mxu0 %v1337_v0  ;;  %v1066_v10 = vld [vmem:[%s1730_s2] ss:$0 sm:$0xff]  ;;  %1191 = vmatprep.subr.mxu1 %v1337_v0  ;;  %v133_v21 = vld [vmem:[%s1728_s1 + $0x58] sm:$0xff]  ;;  %v132_v22 = vld [vmem:[%s1728_s1 + $0x50] sm:$0xff] }
   0x6   :  { %1175 = vmatpush3.msra.mxu0 %v20_v3  ;;  %1192 = vmatpush3.msra.mxu1 %v136_v18  ;;  %v134_v20 = vld [vmem:[%s1728_s1 + $0x60] sm:$0xff]  ;;  %v131_v23 = vld [vmem:[%s1728_s1 + $0x48] sm:$0xff]  ;;  %v248_v47 = vld [vmem:[%s1728_s1 + $0x98] sm:$0xff] }
   0x7   :  { %1176 = vmatprep.subr.mxu0 %v1337_v0  ;;  %1193 = vmatprep.subr.mxu1 %v1337_v0  ;;  %v130_v24 = vld [vmem:[%s1728_s1 + $0x40] sm:$0xff]  ;;  %v247_v48 = vld [vmem:[%s1728_s1 + $0x90] sm:$0xff]  ;;  %v246_v49 = vld [vmem:[%s1728_s1 + $0x88] sm:$0xff] }
   0x8   :  { %1177 = vmatpush3.msra.mxu0 %v19_v4  ;;  %1194 = vmatpush3.msra.mxu1 %v135_v19  ;;  %v1068_v34 = vld [vmem:[%s1730_s2 + $0x1] ss:$0 sm:$0xff]  ;;  %v1069_v36 = vld [vmem:[%s1730_s2 + $0x2] ss:$0 sm:$0xff]  ;;  %v1070_v40 = vld [vmem:[%s1730_s2 + $0x3] ss:$0 sm:$0xff] }
   0x9   :  { %1178 = vmatprep.subr.mxu0 %v1337_v0  ;;  %1195 = vmatprep.subr.mxu1 %v1337_v0  ;;  %v245_v50 = vld [vmem:[%s1728_s1 + $0x80] sm:$0xff]  ;;  %v443_v17 = vld [vmem:[%s1728_s1 + $0xe8] sm:$0xff]  ;;  %v441_v19 = vld [vmem:[%s1728_s1 + $0xd8] sm:$0xff] }
   0xa   :  { %1179 = vmatpush3.msra.mxu0 %v18_v5  ;;  %1196 = vmatpush3.msra.mxu1 %v134_v20  ;;  %v1072_v60 = vld [vmem:[%s1730_s2 + $0x4] ss:$0 sm:$0xff]  ;;  %v1073_v62 = vld [vmem:[%s1730_s2 + $0x5] ss:$0 sm:$0xff]  ;;  %v1074_v3 = vld [vmem:[%s1730_s2 + $0x6] ss:$0 sm:$0xff] }
   0xb   :  { %1180 = vmatprep.subr.mxu0 %v1337_v0  ;;  %1197 = vmatprep.subr.mxu1 %v1337_v0  ;;  %v442_v18 = vld [vmem:[%s1728_s1 + $0xe0] sm:$0xff] }
   0xc   :  { %1181 = vmatpush3.msra.mxu0 %v17_v6  ;;  %1198 = vmatpush3.msra.mxu1 %v133_v21 }
   0xd   :  { %1182 = vmatprep.subr.mxu0 %v1337_v0  ;;  %1199 = vmatprep.subr.mxu1 %v1337_v0 }
   0xe   :  { %1183 = vmatpush3.msra.mxu0 %v16_v7  ;;  %1200 = vmatpush3.msra.mxu1 %v132_v22 }
   0xf   :  { %1184 = vmatprep.subr.mxu0 %v1337_v0  ;;  %1201 = vmatprep.subr.mxu1 %v1337_v0 }
  0x10   :  { %1185 = vmatpush3.msra.mxu0 %v15_v8  ;;  %1202 = vmatpush3.msra.mxu1 %v131_v23 }
  0x11   :  { %1187 = vmatmul.mubr.msk.f32.vlgmr.msra.gmra.mxu0 %vm28_vm1, %v14_v9  ;;  %1208 = vmatprep.subr.mxu0 %v1337_v0 }
  0x12   :  { %1216 = vmatprep.mubr.msk.f32.mxu0 %vm1338_vm0, %v1337_v0  ;;  %1203 = vmatprep.subr.mxu1 %v1337_v0 }
  0x13   :  { %1204 = vmatpush3.msra.mxu1 %v130_v24  ;;  %1209 = vmatpush3.msra.mxu0 %v248_v47 }
  0x14   :  { %1219 = vmatprep.subr.mxu1 %v1337_v0  ;;  %1210 = vmatprep.subr.mxu0 %v1337_v0 }
  0x15   :  { %1211 = vmatpush3.msra.mxu0 %v247_v48 }
  0x16   :  { %1212 = vmatprep.subr.mxu0 %v1337_v0 }
  0x17   :  { %1213 = vmatpush3.msra.mxu0 %v246_v49 }
  0x18   :  { %1214 = vmatprep.subr.mxu0 %v1337_v0 }
  0x19   :  { %1215 = vmatpush3.msra.mxu0 %v245_v50  ;;  %v555_v50 = vld [vmem:[%s1728_s1 + $0x118] sm:$0xff] }
  0x1a   :  { %1230 = vmatprep.subr.mxu0 %v1337_v0 }
  0xd1   :  { %v98_v11 = vpop.f32.mrf.mxu0 }
  0xd2   :  { %v99_v12 = vadd.f32 %v1066_v10, %v98_v11  ;;  %v358_v11 = vld [vmem:[%s1728_s1 + $0xb8] sm:$0xff] }
  0xd3   :  { %v1188_v13 = vpop.f32.mrf.mxu0 }
  0xd4   :  { %v102_v14 = vsel %vm28_vm1, %v99_v12, 0.0  ;;  %v106_v15 = vmul.f32 %v99_v12, %v99_v12  ;;  %v356_v13 = vld [vmem:[%s1728_s1 + $0xa8] sm:$0xff] }
  0xd5   :  { %103 = vadd.xlane.f32.xlu0 %v102_v14  ;;  %v355_v14 = vld [vmem:[%s1728_s1 + $0xa0] sm:$0xff] }
  0xd6   :  { %v107_v16 = vsel %vm28_vm1, %v106_v15, 0.0  ;;  %v445_v15 = vld [vmem:[%s1728_s1 + $0xf8] sm:$0xff] }
  0xd9   :  { %108 = vadd.xlane.f32.xlu0 %v107_v16  ;;  %v444_v16 = vld [vmem:[%s1728_s1 + $0xf0] sm:$0xff] }
 0x15e   :  { %v104_v25 = vpop.xlane.xlu0 %103 }
 0x15f   :  { %v105_v26 = vmul.f32 0.015625, %v104_v25 }
 0x161   :  { %v111_v28 = vmul.f32 %v105_v26, %v105_v26  ;;  %v113_v32 = vsub.f32 %v99_v12, %v105_v26  ;;  %v357_v12 = vld [vmem:[%s1728_s1 + $0xb0] sm:$0xff] }
 0x162   :  { %v109_v27 = vpop.xlane.xlu0 %108 }
 0x163   :  { %v110_v29 = vmul.f32 0.015625, %v109_v27 }
 0x165   :  { %v112_v30 = vsub.f32 %v110_v29, %v111_v28  ;;  %v1076_v29 = vld [vmem:[%s1730_s2 + $0x7] ss:$0 sm:$0xff] }
 0x167   :  { %v114_v31 = vadd.f32 1e-05, %v112_v30 }
 0x169   :  { %1323 = vrsqrt.f32 %v114_v31  ;;  %v1077_v31 = vld [vmem:[%s1730_s2 + $0x8] ss:$0 sm:$0xff] }
 0x176   :  { %v1324_v33 = vpop.eup %1323 }
 0x177   :  { %v116_v35 = vmul.f32 %v1324_v33, %v113_v32 }
 0x179   :  { %v122_v37 = vmul.f32 %v1068_v34, %v116_v35  ;;  %v440_v34 = vld [vmem:[%s1728_s1 + $0xd0] sm:$0xff]  ;;  %v439_v35 = vld [vmem:[%s1728_s1 + $0xc8] sm:$0xff] }
 0x17b   :  { %v128_v38 = vadd.f32 %v1069_v36, %v122_v37  ;;  %v438_v36 = vld [vmem:[%s1728_s1 + $0xc0] sm:$0xff]  ;;  %v1078_v37 = vld [vmem:[%s1730_s2 + $0x9] ss:$0 sm:$0xff] }
 0x17d   :  { %v129_v39 = vmax.f32 %v128_v38, 0.0 }
 0x17f   :  { %1206 = vmatmul.mubr.msk.f32.vlgmr.msra.gmra.mxu1 %vm28_vm1, %v129_v39 }
 0x180   :  { %1227 = vmatprep.mubr.msk.f32.mxu1 %vm1338_vm0, %v1337_v0  ;;  %1220 = vmatpush3.msra.mxu1 %v358_v11 }
 0x181   :  { %1221 = vmatprep.subr.mxu1 %v1337_v0 }
 0x182   :  { %1222 = vmatpush3.msra.mxu1 %v357_v12 }
 0x183   :  { %1223 = vmatprep.subr.mxu1 %v1337_v0 }
 0x184   :  { %1224 = vmatpush3.msra.mxu1 %v356_v13  ;;  %v665_v13 = vld [vmem:[%s1728_s1 + $0x138] sm:$0xff] }
 0x185   :  { %1225 = vmatprep.subr.mxu1 %v1337_v0 }
 0x186   :  { %1226 = vmatpush3.msra.mxu1 %v355_v14  ;;  %v664_v14 = vld [vmem:[%s1728_s1 + $0x130] sm:$0xff] }
 0x187   :  { %1249 = vmatprep.subr.mxu1 %v1337_v0 }
 0x23f   :  { %v212_v41 = vpop.f32.mrf.mxu1 }
 0x240   :  { %v213_v42 = vadd.f32 %v1070_v40, %v212_v41 }
 0x241   :  { %v1207_v43 = vpop.f32.mrf.mxu1 }
 0x242   :  { %v217_v44 = vsel %vm216_vm2, %v213_v42, 0.0  ;;  %v221_v45 = vmul.f32 %v213_v42, %v213_v42 }
 0x243   :  { %218 = vadd.xlane.f32.xlu1 %v217_v44 }
 0x244   :  { %v222_v46 = vsel %vm216_vm2, %v221_v45, 0.0 }
 0x247   :  { %223 = vadd.xlane.f32.xlu1 %v222_v46 }
 0x2cc   :  { %v219_v51 = vpop.xlane.xlu1 %218 }
 0x2cd   :  { %v220_v52 = vmul.f32 0.03125, %v219_v51  ;;  %v554_v51 = vld [vmem:[%s1728_s1 + $0x110] sm:$0xff] }
 0x2cf   :  { %v226_v54 = vmul.f32 %v220_v52, %v220_v52  ;;  %v228_v58 = vsub.f32 %v213_v42, %v220_v52  ;;  %v1080_v42 = vld [vmem:[%s1730_s2 + $0xa] ss:$0 sm:$0xff] }
 0x2d0   :  { %v224_v53 = vpop.xlane.xlu1 %223  ;;  %v553_v52 = vld [vmem:[%s1728_s1 + $0x108] sm:$0xff] }
 0x2d1   :  { %v225_v55 = vmul.f32 0.03125, %v224_v53  ;;  %v552_v53 = vld [vmem:[%s1728_s1 + $0x100] sm:$0xff] }
 0x2d3   :  { %v227_v56 = vsub.f32 %v225_v55, %v226_v54 }
 0x2d5   :  { %v229_v57 = vadd.f32 1e-05, %v227_v56 }
 0x2d7   :  { %1325 = vrsqrt.f32 %v229_v57 }
 0x2e4   :  { %v1326_v59 = vpop.eup %1325 }
 0x2e5   :  { %v231_v61 = vmul.f32 %v1326_v59, %v228_v58 }
 0x2e7   :  { %v237_v63 = vmul.f32 %v1072_v60, %v231_v61 }
 0x2e9   :  { %v243_v1 = vadd.f32 %v1073_v62, %v237_v63  ;;  %v1082_v63 = vld [vmem:[%s1730_s2 + $0xb] ss:$0 sm:$0xff] }
 0x2eb   :  { %v244_v2 = vmax.f32 %v243_v1, 0.0 }
 0x2ed   :  { %1217 = vmatmul.mubr.msk.f32.vlgmr.msra.gmra.mxu0 %vm216_vm2, %v244_v2 }
 0x2ee   :  { %1246 = vmatprep.mubr.msk.f32.mxu0 %vm1338_vm0, %v1337_v0  ;;  %1231 = vmatpush3.msra.mxu0 %v445_v15  ;;  %v663_v15 = vld [vmem:[%s1728_s1 + $0x128] sm:$0xff] }
 0x2ef   :  { %1232 = vmatprep.subr.mxu0 %v1337_v0 }
 0x2f0   :  { %1233 = vmatpush3.msra.mxu0 %v444_v16  ;;  %v662_v16 = vld [vmem:[%s1728_s1 + $0x120] sm:$0xff] }
 0x2f1   :  { %1234 = vmatprep.subr.mxu0 %v1337_v0 }
 0x2f2   :  { %1235 = vmatpush3.msra.mxu0 %v443_v17  ;;  %v752_v17 = vld [vmem:[%s1728_s1 + $0x178] sm:$0xff] }
 0x2f3   :  { %1236 = vmatprep.subr.mxu0 %v1337_v0 }
 0x2f4   :  { %1237 = vmatpush3.msra.mxu0 %v442_v18  ;;  %v751_v18 = vld [vmem:[%s1728_s1 + $0x170] sm:$0xff] }
 0x2f5   :  { %1238 = vmatprep.subr.mxu0 %v1337_v0 }
 0x2f6   :  { %1239 = vmatpush3.msra.mxu0 %v441_v19  ;;  %v750_v19 = vld [vmem:[%s1728_s1 + $0x168] sm:$0xff] }
 0x2f7   :  { %1240 = vmatprep.subr.mxu0 %v1337_v0 }
 0x2f8   :  { %1241 = vmatpush3.msra.mxu0 %v440_v34 }
 0x2f9   :  { %1242 = vmatprep.subr.mxu0 %v1337_v0 }
 0x2fa   :  { %1243 = vmatpush3.msra.mxu0 %v439_v35 }
 0x2fb   :  { %1244 = vmatprep.subr.mxu0 %v1337_v0 }
 0x2fc   :  { %1245 = vmatpush3.msra.mxu0 %v438_v36  ;;  %v747_v36 = vld [vmem:[%s1728_s1 + $0x150] sm:$0xff] }
 0x2fd   :  { %1271 = vmatprep.subr.mxu0 %v1337_v0 }
 0x3ad   :  { %v323_v4 = vpop.f32.mrf.mxu0 }
 0x3ae   :  { %v324_v5 = vadd.f32 %v1074_v3, %v323_v4 }
 0x3af   :  { %v1218_v6 = vpop.f32.mrf.mxu0 }
 0x3b0   :  { %v327_v7 = vadd.f32 %v324_v5, %v244_v2  ;;  %v1083_v2 = vld [vmem:[%s1730_s2 + $0xc] ss:$0 sm:$0xff]  ;;  %v1084_v5 = vld [vmem:[%s1730_s2 + $0xd] ss:$0 sm:$0xff] }
 0x3b2   :  { %v328_v8 = vsel %vm216_vm2, %v327_v7, 0.0  ;;  %v332_v9 = vmul.f32 %v327_v7, %v327_v7 }
 0x3b3   :  { %329 = vadd.xlane.f32.xlu0 %v328_v8 }
 0x3b4   :  { %v333_v10 = vsel %vm216_vm2, %v332_v9, 0.0 }
 0x3b5   :  { %334 = vadd.xlane.f32.xlu1 %v333_v10 }
 0x43c   :  { %v330_v20 = vpop.xlane.xlu0 %329 }
 0x43d   :  { %v331_v21 = vmul.f32 0.03125, %v330_v20  ;;  %v749_v20 = vld [vmem:[%s1728_s1 + $0x160] sm:$0xff] }
 0x43e   :  { %v335_v22 = vpop.xlane.xlu1 %334 }
 0x43f   :  { %v337_v23 = vmul.f32 %v331_v21, %v331_v21  ;;  %v336_v24 = vmul.f32 0.03125, %v335_v22  ;;  %v339_v27 = vsub.f32 %v327_v7, %v331_v21  ;;  %v748_v21 = vld [vmem:[%s1728_s1 + $0x158] sm:$0xff] }
 0x441   :  { %v338_v25 = vsub.f32 %v336_v24, %v337_v23 }
 0x443   :  { %v340_v26 = vadd.f32 1e-05, %v338_v25 }
 0x445   :  { %1327 = vrsqrt.f32 %v340_v26 }
 0x452   :  { %v1328_v28 = vpop.eup %1327 }
 0x453   :  { %v342_v30 = vmul.f32 %v1328_v28, %v339_v27 }
 0x455   :  { %v348_v32 = vmul.f32 %v1076_v29, %v342_v30 }
 0x457   :  { %v354_v33 = vadd.f32 %v1077_v31, %v348_v32  ;;  %v1086_v31 = vld [vmem:[%s1730_s2 + $0xe] ss:$0 sm:$0xff] }
 0x459   :  { %1228 = vmatmul.mubr.msk.f32.vlgmr.msra.gmra.mxu1 %vm216_vm2, %v354_v33 }
 0x45a   :  { %1257 = vmatprep.mubr.msk.f32.mxu1 %vm1338_vm0, %v1337_v0  ;;  %1250 = vmatpush3.msra.mxu1 %v555_v50 }
 0x45b   :  { %1251 = vmatprep.subr.mxu1 %v1337_v0 }
 0x45c   :  { %1252 = vmatpush3.msra.mxu1 %v554_v51 }
 0x45d   :  { %1253 = vmatprep.subr.mxu1 %v1337_v0 }
 0x45e   :  { %1254 = vmatpush3.msra.mxu1 %v553_v52  ;;  %v862_v52 = vld [vmem:[%s1728_s1 + $0x198] sm:$0xff] }
 0x45f   :  { %1255 = vmatprep.subr.mxu1 %v1337_v0 }
 0x460   :  { %1256 = vmatpush3.msra.mxu1 %v552_v53  ;;  %v861_v53 = vld [vmem:[%s1728_s1 + $0x190] sm:$0xff] }
 0x461   :  { %1260 = vmatprep.subr.mxu1 %v1337_v0 }
 0x519   :  { %v433_v38 = vpop.f32.mrf.mxu1 }
 0x51a   :  { %v434_v39 = vadd.f32 %v1078_v37, %v433_v38  ;;  %v746_v37 = vld [vmem:[%s1728_s1 + $0x148] sm:$0xff]  ;;  %v745_v38 = vld [vmem:[%s1728_s1 + $0x140] sm:$0xff] }
 0x51b   :  { %v1229_v40 = vpop.f32.mrf.mxu1 }
 0x51c   :  { %v437_v41 = vmax.f32 %v434_v39, 0.0  ;;  %v1088_v39 = vld [vmem:[%s1730_s2 + $0x10] ss:$0 sm:$0xff] }
 0x51e   :  { %1247 = vmatmul.mubr.msk.f32.vlgmr.msra.gmra.mxu0 %vm28_vm1, %v437_v41 }
 0x51f   :  { %1287 = vmatprep.mubr.msk.f32.mxu0 %vm1338_vm0, %v1337_v0  ;;  %1272 = vmatpush3.msra.mxu0 %v752_v17  ;;  %v974_v17 = vld [vmem:[%s1728_s1 + $0x1c8] sm:$0xff] }
 0x520   :  { %1273 = vmatprep.subr.mxu0 %v1337_v0 }
 0x521   :  { %1274 = vmatpush3.msra.mxu0 %v751_v18  ;;  %v973_v18 = vld [vmem:[%s1728_s1 + $0x1c0] sm:$0xff] }
 0x522   :  { %1275 = vmatprep.subr.mxu0 %v1337_v0 }
 0x523   :  { %1276 = vmatpush3.msra.mxu0 %v750_v19  ;;  %v972_v19 = vld [vmem:[%s1728_s1 + $0x1b8] sm:$0xff] }
 0x524   :  { %1277 = vmatprep.subr.mxu0 %v1337_v0 }
 0x525   :  { %1278 = vmatpush3.msra.mxu0 %v749_v20  ;;  %v970_v20 = vld [vmem:[%s1728_s1 + $0x1a8] sm:$0xff] }
 0x526   :  { %1279 = vmatprep.subr.mxu0 %v1337_v0 }
 0x527   :  { %1280 = vmatpush3.msra.mxu0 %v748_v21  ;;  %v969_v21 = vld [vmem:[%s1728_s1 + $0x1a0] sm:$0xff] }
 0x528   :  { %1281 = vmatprep.subr.mxu0 %v1337_v0 }
 0x529   :  { %1282 = vmatpush3.msra.mxu0 %v747_v36  ;;  %v1098_v36 = vld [vmem:[%s1730_s2 + $0x17] ss:$0 sm:$0xff] }
 0x52a   :  { %1283 = vmatprep.subr.mxu0 %v1337_v0 }
 0x52b   :  { %1284 = vmatpush3.msra.mxu0 %v746_v37 }
 0x52c   :  { %1285 = vmatprep.subr.mxu0 %v1337_v0 }
 0x52d   :  { %1286 = vmatpush3.msra.mxu0 %v745_v38 }
 0x5de   :  { %v520_v43 = vpop.f32.mrf.mxu0 }
 0x5df   :  { %v521_v44 = vadd.f32 %v1080_v42, %v520_v43 }
 0x5e0   :  { %v1248_v45 = vpop.f32.mrf.mxu0 }
 0x5e1   :  { %v524_v46 = vadd.f32 %v521_v44, %v354_v33  ;;  %v1087_v33 = vld [vmem:[%s1730_s2 + $0xf] ss:$0 sm:$0xff]  ;;  %v1090_v44 = vld [vmem:[%s1730_s2 + $0x11] ss:$0 sm:$0xff] }
 0x5e3   :  { %v525_v47 = vsel %vm216_vm2, %v524_v46, 0.0  ;;  %v529_v48 = vmul.f32 %v524_v46, %v524_v46 }
 0x5e4   :  { %526 = vadd.xlane.f32.xlu0 %v525_v47 }
 0x5e5   :  { %v530_v49 = vsel %vm216_vm2, %v529_v48, 0.0 }
 0x5e6   :  { %531 = vadd.xlane.f32.xlu1 %v530_v49 }
 0x66d   :  { %v527_v54 = vpop.xlane.xlu0 %526 }
 0x66e   :  { %v528_v55 = vmul.f32 0.03125, %v527_v54  ;;  %v860_v54 = vld [vmem:[%s1728_s1 + $0x188] sm:$0xff] }
 0x66f   :  { %v532_v56 = vpop.xlane.xlu1 %531 }
 0x670   :  { %v534_v57 = vmul.f32 %v528_v55, %v528_v55  ;;  %v533_v58 = vmul.f32 0.03125, %v532_v56  ;;  %v536_v61 = vsub.f32 %v524_v46, %v528_v55  ;;  %v859_v55 = vld [vmem:[%s1728_s1 + $0x180] sm:$0xff] }
 0x672   :  { %v535_v59 = vsub.f32 %v533_v58, %v534_v57 }
 0x674   :  { %v537_v60 = vadd.f32 1e-05, %v535_v59 }
 0x676   :  { %1329 = vrsqrt.f32 %v537_v60 }
 0x683   :  { %v1330_v62 = vpop.eup %1329 }
 0x684   :  { %v539_v1 = vmul.f32 %v1330_v62, %v536_v61 }
 0x686   :  { %v545_v3 = vmul.f32 %v1082_v63, %v539_v1 }
 0x688   :  { %v1575_v4 = vadd.f32 %v1083_v2, %v545_v3  ;;  %v1092_v2 = vld [vmem:[%s1730_s2 + $0x12] ss:$0 sm:$0xff] }
 0x68a   :  { %1258 = vmatmul.mubr.msk.f32.vlgmr.msra.gmra.mxu1 %vm216_vm2, %v1575_v4 }
 0x68b   :  { %1268 = vmatprep.mubr.msk.f32.mxu1 %vm1338_vm0, %v1337_v0  ;;  %1261 = vmatpush3.msra.mxu1 %v665_v13 }
 0x68c   :  { %1262 = vmatprep.subr.mxu1 %v1337_v0 }
 0x68d   :  { %1263 = vmatpush3.msra.mxu1 %v664_v14 }
 0x68e   :  { %1264 = vmatprep.subr.mxu1 %v1337_v0 }
 0x68f   :  { %1265 = vmatpush3.msra.mxu1 %v663_v15  ;;  %v976_v15 = vld [vmem:[%s1728_s1 + $0x1d8] sm:$0xff] }
 0x690   :  { %1266 = vmatprep.subr.mxu1 %v1337_v0 }
 0x691   :  { %1267 = vmatpush3.msra.mxu1 %v662_v16  ;;  %v975_v16 = vld [vmem:[%s1728_s1 + $0x1d0] sm:$0xff] }
 0x692   :  { %1290 = vmatprep.subr.mxu1 %v1337_v0 }
 0x74a   :  { %v630_v6 = vpop.f32.mrf.mxu1 }
 0x74b   :  { %v631_v7 = vadd.f32 %v1084_v5, %v630_v6  ;;  %v1093_v5 = vld [vmem:[%s1730_s2 + $0x13] ss:$0 sm:$0xff] }
 0x74c   :  { %v1259_v8 = vpop.f32.mrf.mxu1 }
 0x74d   :  { %v634_v9 = vadd.f32 %v631_v7, %v1575_v4  ;;  %v1094_v8 = vld [vmem:[%s1730_s2 + $0x14] ss:$0 sm:$0xff] }
 0x74f   :  { %v635_v10 = vsel %vm216_vm2, %v634_v9, 0.0  ;;  %v639_v11 = vmul.f32 %v634_v9, %v634_v9 }
 0x750   :  { %636 = vadd.xlane.f32.xlu0 %v635_v10 }
 0x751   :  { %v640_v12 = vsel %vm216_vm2, %v639_v11, 0.0 }
 0x752   :  { %641 = vadd.xlane.f32.xlu1 %v640_v12 }
 0x7d9   :  { %v637_v22 = vpop.xlane.xlu0 %636 }
 0x7da   :  { %v638_v23 = vmul.f32 0.03125, %v637_v22 }
 0x7db   :  { %v642_v24 = vpop.xlane.xlu1 %641 }
 0x7dc   :  { %v644_v25 = vmul.f32 %v638_v23, %v638_v23  ;;  %v643_v26 = vmul.f32 0.03125, %v642_v24  ;;  %v646_v29 = vsub.f32 %v634_v9, %v638_v23 }
 0x7de   :  { %v645_v27 = vsub.f32 %v643_v26, %v644_v25 }
 0x7e0   :  { %v647_v28 = vadd.f32 1e-05, %v645_v27 }
 0x7e2   :  { %1331 = vrsqrt.f32 %v647_v28 }
 0x7ef   :  { %v1332_v30 = vpop.eup %1331 }
 0x7f0   :  { %v649_v32 = vmul.f32 %v1332_v30, %v646_v29 }
 0x7f2   :  { %v655_v34 = vmul.f32 %v1086_v31, %v649_v32  ;;  %v1096_v31 = vld [vmem:[%s1730_s2 + $0x15] ss:$0 sm:$0xff] }
 0x7f4   :  { %v661_v35 = vadd.f32 %v1087_v33, %v655_v34 }
 0x7f6   :  { %1269 = vmatmul.mubr.msk.f32.vlgmr.msra.gmra.mxu1 %vm216_vm2, %v661_v35 }
 0x7f7   :  { %1298 = vmatprep.mubr.msk.f32.mxu1 %vm1338_vm0, %v1337_v0  ;;  %1291 = vmatpush3.msra.mxu1 %v862_v52 }
 0x7f8   :  { %1292 = vmatprep.subr.mxu1 %v1337_v0 }
 0x7f9   :  { %1293 = vmatpush3.msra.mxu1 %v861_v53 }
 0x7fa   :  { %1294 = vmatprep.subr.mxu1 %v1337_v0 }
 0x7fb   :  { %1295 = vmatpush3.msra.mxu1 %v860_v54 }
 0x7fc   :  { %1296 = vmatprep.subr.mxu1 %v1337_v0 }
 0x7fd   :  { %1297 = vmatpush3.msra.mxu1 %v859_v55 }
 0x7fe   :  { %1301 = vmatprep.subr.mxu1 %v1337_v0 }
 0x8b6   :  { %v740_v40 = vpop.f32.mrf.mxu1 }
 0x8b7   :  { %v741_v41 = vadd.f32 %v1088_v39, %v740_v40 }
 0x8b8   :  { %v1270_v42 = vpop.f32.mrf.mxu1 }
 0x8b9   :  { %v744_v43 = vmax.f32 %v741_v41, 0.0 }
 0x8bb   :  { %1288 = vmatmul.mubr.msk.f32.vlgmr.msra.gmra.mxu0 %vm28_vm1, %v744_v43 }
 0x97b   :  { %v827_v45 = vpop.f32.mrf.mxu0 }
 0x97c   :  { %v828_v46 = vadd.f32 %v1090_v44, %v827_v45 }
 0x97d   :  { %v1289_v47 = vpop.f32.mrf.mxu0 }
 0x97e   :  { %v831_v48 = vadd.f32 %v828_v46, %v661_v35 }
 0x980   :  { %v832_v49 = vsel %vm216_vm2, %v831_v48, 0.0  ;;  %v836_v50 = vmul.f32 %v831_v48, %v831_v48 }
 0x981   :  { %833 = vadd.xlane.f32.xlu0 %v832_v49 }
 0x982   :  { %v837_v51 = vsel %vm216_vm2, %v836_v50, 0.0 }
 0x983   :  { %838 = vadd.xlane.f32.xlu1 %v837_v51 }
 0xa0a   :  { %v834_v56 = vpop.xlane.xlu0 %833 }
 0xa0b   :  { %v835_v57 = vmul.f32 0.03125, %v834_v56 }
 0xa0c   :  { %v839_v58 = vpop.xlane.xlu1 %838 }
 0xa0d   :  { %v841_v59 = vmul.f32 %v835_v57, %v835_v57  ;;  %v840_v60 = vmul.f32 0.03125, %v839_v58  ;;  %v843_v63 = vsub.f32 %v831_v48, %v835_v57 }
 0xa0f   :  { %v842_v61 = vsub.f32 %v840_v60, %v841_v59 }
 0xa11   :  { %v844_v62 = vadd.f32 1e-05, %v842_v61 }
 0xa13   :  { %1333 = vrsqrt.f32 %v844_v62 }
 0xa20   :  { %v1334_v1 = vpop.eup %1333 }
 0xa21   :  { %v846_v3 = vmul.f32 %v1334_v1, %v843_v63 }
 0xa23   :  { %v852_v6 = vmul.f32 %v1092_v2, %v846_v3 }
 0xa25   :  { %v858_v7 = vadd.f32 %v1093_v5, %v852_v6 }
 0xa27   :  { %1299 = vmatmul.mubr.msk.f32.vlgmr.msra.gmra.mxu1 %vm216_vm2, %v858_v7 }
 0xa28   :  { %1317 = vmatprep.mubr.msk.f32.mxu1 %vm1338_vm0, %v1337_v0  ;;  %1302 = vmatpush3.msra.mxu1 %v976_v15 }
 0xa29   :  { %1303 = vmatprep.subr.mxu1 %v1337_v0 }
 0xa2a   :  { %1304 = vmatpush3.msra.mxu1 %v975_v16 }
 0xa2b   :  { %1305 = vmatprep.subr.mxu1 %v1337_v0 }
 0xa2c   :  { %1306 = vmatpush3.msra.mxu1 %v974_v17 }
 0xa2d   :  { %1307 = vmatprep.subr.mxu1 %v1337_v0 }
 0xa2e   :  { %1308 = vmatpush3.msra.mxu1 %v973_v18 }
 0xa2f   :  { %1309 = vmatprep.subr.mxu1 %v1337_v0 }
 0xa30   :  { %1310 = vmatpush3.msra.mxu1 %v972_v19 }
 0xa31   :  { %1311 = vmatprep.subr.mxu1 %v1337_v0 }
 0xae7   :  { %v937_v9 = vpop.f32.mrf.mxu1 }
 0xae8   :  { %v938_v10 = vadd.f32 %v1094_v8, %v937_v9 }
 0xae9   :  { %v1300_v11 = vpop.f32.mrf.mxu1 }
 0xaea   :  { %v941_v12 = vsel %vm28_vm1, %v938_v10, 0.0  ;;  %v945_v13 = vmul.f32 %v938_v10, %v938_v10 }
 0xaeb   :  { %942 = vadd.xlane.f32.xlu0 %v941_v12 }
 0xaec   :  { %v946_v14 = vsel %vm28_vm1, %v945_v13, 0.0 }
 0xaed   :  { %947 = vadd.xlane.f32.xlu1 %v946_v14 }
 0xb01   :  { %1055 = vrot.lane.b32.xlu0 %v1575_v4, %s1339_s26  ;;  %v971_v4 = vld [vmem:[%s1728_s1 + $0x1b0] sm:$0xff] }
 0xb02   :  { %1312 = vmatpush3.msra.mxu1 %v971_v4 }
 0xb03   :  { %1313 = vmatprep.subr.mxu1 %v1337_v0 }
 0xb04   :  { %1314 = vmatpush3.msra.mxu1 %v970_v20 }
 0xb05   :  { %1315 = vmatprep.subr.mxu1 %v1337_v0  ;;  %v1097_v0 = vld [vmem:[%s1730_s2 + $0x16] ss:$0 sm:$0xff] }
 0xb06   :  { %1316 = vmatpush3.msra.mxu1 %v969_v21 }
 0xb74   :  { %v943_v22 = vpop.xlane.xlu0 %942 }
 0xb75   :  { %v944_v23 = vmul.f32 0.015625, %v943_v22 }
 0xb76   :  { %v948_v24 = vpop.xlane.xlu1 %947 }
 0xb77   :  { %v950_v25 = vmul.f32 %v944_v23, %v944_v23  ;;  %v949_v26 = vmul.f32 0.015625, %v948_v24  ;;  %v952_v29 = vsub.f32 %v938_v10, %v944_v23 }
 0xb78   :  { %v1056_v39 = vpop.permute.xlu0 %1055 }
 0xb79   :  { %v951_v27 = vsub.f32 %v949_v26, %v950_v25 }
 0xb7b   :  { %v953_v28 = vadd.f32 1e-05, %v951_v27 }
 0xb7d   :  { %1335 = vrsqrt.f32 %v953_v28 }
 0xb8a   :  { %v1336_v30 = vpop.eup %1335 }
 0xb8b   :  { %v955_v32 = vmul.f32 %v1336_v30, %v952_v29 }
 0xb8d   :  { %v961_v33 = vmul.f32 %v1096_v31, %v955_v32 }
 0xb8f   :  { %v967_v34 = vadd.f32 %v1097_v0, %v961_v33 }
 0xb91   :  { %v968_v35 = vmax.f32 %v967_v34, 0.0 }
 0xb93   :  { %1318 = vmatmul.mubr.msk.f32.vlgmr.msra.gmra.mxu1 %vm28_vm1, %v968_v35 }
 0xc53   :  { %v1051_v37 = vpop.f32.mrf.mxu1 }
 0xc54   :  { %v1052_v38 = vadd.f32 %v1098_v36, %v1051_v37 }
 0xc55   :  { %v1319_v40 = vpop.f32.mrf.mxu1 }
 0xc56   :  { %v1058_v41 = vsel %vm28_vm1, %v1052_v38, %v1056_v39 }
 0xc57   :  { %v1060_v42 = vsel %vm1059_vm3, %v1058_v41, 0.0 }
 0xc58   :  { %1061 = vst [vmem:[%s1731_s3] sm:$0xff] %v1060_v42 }

</bundles_post_ra>
